<compile_context>
chip_gen: v5e
topology: v5e:2x2
jax: 0.10.0
libtpu: 0.0.40
codegen_flags: <defaults>
</compile_context>

<pallas_src>
import jax
import jax.numpy as jnp
import numpy as np
from jax.experimental import pallas as pl
from jax.experimental.pallas import tpu as pltpu


def _pycnnik_kernel(x_ref, w1_ref, w2_ref, b2_ref, o_ref):
    # x_ref : (K1, TB)   K1 = S*7 + 1 (constant-ones row), batch on lanes
    # w1_ref: (384, K1)  block-diagonal linear1.weight with b1 as last column
    # w2_ref: (7, 384)   out.weight, untouched
    # b2_ref: (7, 1)
    # o_ref : (7, TB)    lane-dense output tile
    h = jnp.dot(w1_ref[...], x_ref[...], preferred_element_type=jnp.float32)
    h = jnp.maximum(h, 0.1 * h)                                # LeakyReLU(0.1)
    o_ref[...] = (jnp.dot(w2_ref[...], h, preferred_element_type=jnp.float32)
                  + b2_ref[...])


def _pick_batch_tile(B):
    """Generation-aware batch (lane) tile size, multiple of 128."""
    kind = ""
    try:
        kind = jax.devices()[0].device_kind.lower()
    except Exception:
        pass
    if "v5" in kind:          # v5e: 16 MiB default scoped VMEM -> keep h small
        tb = 4096
    elif "v6" in kind:        # v6e: 32 MiB default scoped VMEM
        tb = 8192
    elif "7" in kind:         # v7x: fast HBM but only 64 MiB VMEM per TC
        tb = 8192
    else:
        tb = 4096
    b128 = 128 * pl.cdiv(B, 128)
    # v7x has 2 TensorCores per chip: ensure the parallel grid has >= 2 steps.
    if "7" in kind and b128 >= 256:
        tb = min(tb, max(128, (b128 // 2) // 128 * 128))
    tb = min(tb, b128)        # small batches: one small tile, no huge padding
    return max(128, (tb // 128) * 128)


def pycnnik_forward(x, w1, b1, w2, b2, *, tb=None):
    """x: (B, S, 7) f32; w1: (64, 7); b1: (64,); w2: (7, 384); b2: (7,).

    Returns (B, 7) f32.  `tb` is the batch (lane) tile; multiple of 128.
    """
    B, S, F_in = x.shape
    H = w1.shape[0]                  # 64
    n_out = w2.shape[0]              # 7
    assert w2.shape[1] == S * H

    if tb is None:
        tb = _pick_batch_tile(B)
    assert tb % 128 == 0

    b_pad = tb * pl.cdiv(B, tb)
    K1 = S * F_in + 1                # +1 ones row folds b1 into the matmul

    # TODO(synk): ideally the producer emits x already as (S*F_in, B) and the
    # consumer accepts (n_out, B); the transpose/pad below is an extra HBM
    # round-trip outside the kernel for this memory-light op.
    x_t = jnp.transpose(x, (1, 2, 0)).reshape(S * F_in, B)          # (42, B)
    if b_pad != B:
        x_t = jnp.pad(x_t, ((0, 0), (0, b_pad - B)))
    x_aug = jnp.concatenate(
        [x_t, jnp.ones((1, b_pad), x_t.dtype)], axis=0)             # (43, b_pad)

    # Block-diagonal layer-1 weight with the bias folded in as a last column.
    w1_bd = jnp.kron(jnp.eye(S, dtype=w1.dtype), w1)                # (384, 42)
    w1_aug = jnp.concatenate(
        [w1_bd, jnp.tile(b1, S).reshape(S * H, 1)], axis=1)         # (384, 43)
    b2_k = b2.reshape(n_out, 1)

    grid = (b_pad // tb,)

    flops = b_pad * (2 * (S * H) * K1 + 2 * n_out * (S * H))
    bytes_accessed = 4 * (b_pad * K1 + b_pad * n_out
                          + S * H * K1 + n_out * S * H + n_out)

    # Scoped VMEM: h (384, tb) f32 + double-buffered x / out tiles + weights.
    est_vmem = 4 * tb * (S * H + 2 * K1 + 2 * n_out) + (1 << 20)
    vmem_limit = int(min(48 << 20, max(32 << 20, 2 * est_vmem)))

    out_t = pl.pallas_call(
        _pycnnik_kernel,
        out_shape=jax.ShapeDtypeStruct((n_out, b_pad), jnp.float32),
        grid=grid,
        in_specs=[
            pl.BlockSpec((K1, tb), lambda i: (0, i)),            # x tile
            pl.BlockSpec((S * H, K1), lambda i: (0, 0)),         # W1 blockdiag (resident)
            pl.BlockSpec((n_out, S * H), lambda i: (0, 0)),      # W2 (resident)
            pl.BlockSpec((n_out, 1), lambda i: (0, 0)),          # b2
        ],
        out_specs=pl.BlockSpec((n_out, tb), lambda i: (0, i)),
        compiler_params=pltpu.CompilerParams(
            dimension_semantics=("parallel",),
            vmem_limit_bytes=vmem_limit),
        cost_estimate=pl.CostEstimate(
            flops=flops, transcendentals=0, bytes_accessed=bytes_accessed),
    )(x_aug, w1_aug, w2, b2_k)

    return out_t[:, :B].T                                        # (B, n_out)


def _make_params(key):
    """Deterministic synthetic parameters matching the nn.Module shapes."""
    k1, k2, k3, k4 = jax.random.split(key, 4)
    # nn.Linear(7, 64): weight (64, 7), bias (64,)
    w1 = jax.random.normal(k1, (64, 7), jnp.float32) * 0.1
    b1 = jax.random.normal(k2, (64,), jnp.float32) * 0.1
    # nn.Linear(384, 7): weight (7, 384), bias (7,)
    w2 = jax.random.normal(k3, (7, 384), jnp.float32) * 0.05
    b2 = jax.random.normal(k4, (7,), jnp.float32) * 0.05
    return w1, b1, w2, b2


def _reference(x, w1, b1, w2, b2):
    """Pure-JAX reference mirroring the PyTorch forward exactly."""
    B = x.shape[0]
    h = jnp.einsum("bsf,of->bso", x, w1) + b1        # Linear(7, 64)
    h = jnp.where(h >= 0.0, h, 0.1 * h)              # LeakyReLU(0.1)
    h = h.reshape(B, -1)                             # view(B, 384)
    return h @ w2.T + b2                             # Linear(384, 7)


if __name__ == "__main__":
    key = jax.random.PRNGKey(0)
    kx, kp = jax.random.split(key)

    B, S, F_in = 2, 6, 7      # S=6 implied by out.in_features == 384 == 6*64
    x = jax.random.normal(kx, (B, S, F_in), jnp.float32)
    w1, b1, w2, b2 = _make_params(kp)

    y = pycnnik_forward(x, w1, b1, w2, b2)
    y = jax.block_until_ready(y)

    y_ref = _reference(x, w1, b1, w2, b2)
    np.testing.assert_allclose(np.asarray(y), np.asarray(y_ref),
                               rtol=1e-5, atol=1e-5)
    print("KERNEL_OK")
</pallas_src>

<mosaic_0001>
module attributes {stable_mosaic.version = 11 : i64} {
  func.func @_pycnnik_kernel(%arg0: i32, %arg1: memref<43x128xf32, #tpu.memory_space<vmem>>, %arg2: memref<384x43xf32, #tpu.memory_space<vmem>>, %arg3: memref<7x384xf32, #tpu.memory_space<vmem>>, %arg4: memref<7x1xf32, #tpu.memory_space<vmem>>, %arg5: memref<7x128xf32, #tpu.memory_space<vmem>>) attributes {dimension_semantics = [#tpu.dimension_semantics<parallel>], iteration_bounds = array<i64: 1>, scalar_prefetch = 0 : i64, scratch_operands = 0 : i64, tpu.core_type = #tpu.core_type<tc>, window_params = [{transform_indices = @transform_0, window_bounds = array<i64: 43, 128>}, {pipeline_mode = #tpu.pipeline_mode<synchronous>, transform_indices = @transform_1, window_bounds = array<i64: 384, 43>}, {pipeline_mode = #tpu.pipeline_mode<synchronous>, transform_indices = @transform_2, window_bounds = array<i64: 7, 384>}, {pipeline_mode = #tpu.pipeline_mode<synchronous>, transform_indices = @transform_3, window_bounds = array<i64: 7, 1>}, {transform_indices = @transform_4, window_bounds = array<i64: 7, 128>}]} {
    %c0 = arith.constant 0 : index
    %c0_0 = arith.constant 0 : index
    %0 = vector.load %arg2[%c0, %c0_0] : memref<384x43xf32, #tpu.memory_space<vmem>>, vector<384x43xf32>
    %c0_1 = arith.constant 0 : index
    %c0_2 = arith.constant 0 : index
    %1 = vector.load %arg1[%c0_1, %c0_2] : memref<43x128xf32, #tpu.memory_space<vmem>>, vector<43x128xf32>
    %cst = arith.constant dense<0.000000e+00> : vector<384x128xf32>
    %2 = tpu.matmul %0, %1, %cst {dimension_numbers = #tpu.dot_dimension_numbers<[1], [0], [0], [1], [0, 0, 1, 1], [], []>} : vector<384x43xf32>, vector<43x128xf32>, vector<384x128xf32> -> vector<384x128xf32>
    %cst_3 = arith.constant 1.000000e-01 : f32
    %3 = vector.broadcast %cst_3 : f32 to vector<384x128xf32>
    %4 = arith.mulf %3, %2 : vector<384x128xf32>
    %5 = arith.maximumf %2, %4 : vector<384x128xf32>
    %c0_4 = arith.constant 0 : index
    %c0_5 = arith.constant 0 : index
    %6 = vector.load %arg3[%c0_4, %c0_5] : memref<7x384xf32, #tpu.memory_space<vmem>>, vector<7x384xf32>
    %cst_6 = arith.constant dense<0.000000e+00> : vector<7x128xf32>
    %7 = tpu.matmul %6, %5, %cst_6 {dimension_numbers = #tpu.dot_dimension_numbers<[1], [0], [0], [1], [0, 0, 1, 1], [], []>} : vector<7x384xf32>, vector<384x128xf32>, vector<7x128xf32> -> vector<7x128xf32>
    %c0_7 = arith.constant 0 : index
    %c0_8 = arith.constant 0 : index
    %8 = vector.load %arg4[%c0_7, %c0_8] : memref<7x1xf32, #tpu.memory_space<vmem>>, vector<7x1xf32>
    %9 = vector.broadcast %8 : vector<7x1xf32> to vector<7x128xf32>
    %10 = arith.addf %7, %9 : vector<7x128xf32>
    %c0_9 = arith.constant 0 : index
    %c0_10 = arith.constant 0 : index
    %11 = vector.load %arg5[%c0_9, %c0_10] : memref<7x128xf32, #tpu.memory_space<vmem>>, vector<7x128xf32>
    tpu.vector_store %arg5[%c0_9, %c0_10], %10 {strides = array<i32>} : memref<7x128xf32, #tpu.memory_space<vmem>>, vector<7x128xf32>,
    return
  }
  func.func @transform_0(%arg0: i32) -> (i32, i32) {
    %c0_i32 = arith.constant 0 : i32
    %c0_i32_0 = arith.constant 0 : i32
    return %c0_i32, %arg0 : i32, i32
  }
  func.func @transform_1(%arg0: i32) -> (i32, i32) {
    %c0_i32 = arith.constant 0 : i32
    %c0_i32_0 = arith.constant 0 : i32
    %c0_i32_1 = arith.constant 0 : i32
    return %c0_i32, %c0_i32_0 : i32, i32
  }
  func.func @transform_2(%arg0: i32) -> (i32, i32) {
    %c0_i32 = arith.constant 0 : i32
    %c0_i32_0 = arith.constant 0 : i32
    %c0_i32_1 = arith.constant 0 : i32
    return %c0_i32, %c0_i32_0 : i32, i32
  }
  func.func @transform_3(%arg0: i32) -> (i32, i32) {
    %c0_i32 = arith.constant 0 : i32
    %c0_i32_0 = arith.constant 0 : i32
    %c0_i32_1 = arith.constant 0 : i32
    return %c0_i32, %c0_i32_0 : i32, i32
  }
  func.func @transform_4(%arg0: i32) -> (i32, i32) {
    %c0_i32 = arith.constant 0 : i32
    %c0_i32_0 = arith.constant 0 : i32
    return %c0_i32, %arg0 : i32, i32
  }
}

</mosaic_0001>

<bundles_post_ra>
// kernel: tpu_custom_call.1
= control target key start
LH: loop header
LB: loop body
LE: loop exit
PB: predicated region body
PF: predicated region fallthrough
CT: control target
= control target key end

     0   :  { %vm217_vm0 = vcmask 1042432   ;;  %s1020_s0 = inlined_call_operand.vmem [shape: f32[43,128], index: 0, kind: input, shape index: {}]   ;;  %s1021_s1 = inlined_call_operand.vmem [shape: f32[384,43], index: 1, kind: input, shape index: {}]   ;;  %s1022_s2 = inlined_call_operand.vmem [shape: f32[7,384], index: 2, kind: input, shape index: {}]   ;;  %s1023_s3 = inlined_call_operand.vmem [shape: f32[7,1], index: 3, kind: input, shape index: {}]   ;;  %s1024_s4 = inlined_call_operand.hbm [shape: f32[7,128], index: 4, kind: output, shape index: {}]  }
   0x1   :  { %v71_v0 = vld [vmem:[%s1020_s0 + $0x28] sm:$0x7]  ;;  %v70_v1 = vld [vmem:[%s1020_s0 + $0x20] sm:$0xff]  ;;  %v69_v2 = vld [vmem:[%s1020_s0 + $0x18] sm:$0xff] }
   0x2   :  { %564 = vmatpush.msk.msra.mxu0 %vm217_vm0, %v71_v0  ;;  %613 = vmatpush.msk.msra.mxu1 %vm217_vm0, %v71_v0  ;;  %v68_v3 = vld [vmem:[%s1020_s0 + $0x10] sm:$0xff]  ;;  %v67_v4 = vld [vmem:[%s1020_s0 + $0x8] sm:$0xff] }
   0x3   :  { %615 = vmatpush.msk.msra.mxu3 %vm217_vm0, %v71_v0  ;;  %614 = vmatpush.msk.msra.mxu2 %vm217_vm0, %v71_v0 }
   0x4   :  { %232 = vmatpush.msra.mxu0 %v70_v1  ;;  %616 = vmatpush.msra.mxu1 %v70_v1 }
   0x5   :  { %618 = vmatpush.msra.mxu3 %v70_v1  ;;  %617 = vmatpush.msra.mxu2 %v70_v1 }
   0x6   :  { %233 = vmatpush.msra.mxu0 %v69_v2  ;;  %619 = vmatpush.msra.mxu1 %v69_v2 }
   0x7   :  { %621 = vmatpush.msra.mxu3 %v69_v2  ;;  %620 = vmatpush.msra.mxu2 %v69_v2 }
   0x8   :  { %234 = vmatpush.msra.mxu0 %v68_v3  ;;  %622 = vmatpush.msra.mxu1 %v68_v3 }
   0x9   :  { %9 = vsyncpa [#allocation3], 0  ;;  %624 = vmatpush.msra.mxu3 %v68_v3  ;;  %v66_v5 = vld [vmem:[%s1020_s0] sm:$0xff]  ;;  %623 = vmatpush.msra.mxu2 %v68_v3  ;;  %vm72_vm1 = vcmask 351232   ;;  %v32_v7 = vld [vmem:[%s1021_s1 + $0x70] sm:$0xff]  ;;  %s661_s21 = smov [#allocation2]  }
   0xa   :  { %235 = vmatpush.msra.mxu0 %v67_v4  ;;  %625 = vmatpush.msra.mxu1 %v67_v4  ;;  %v18_v6 = vld [vmem:[%s1021_s1] sm:$0xff]  ;;  %v57_v8 = vld [vmem:[%s1021_s1 + $0x138] sm:$0xff]  ;;  %v19_v10 = vld [vmem:[%s1021_s1 + $0x8] sm:$0xff]  ;;  %s553_s22 = sshll.u32 %s661_s21, 4  ;;  %s555_s25 = sshll.u32 %s1024_s4, 4  ;;  %s554_s22 = int_to_ptr.vmem [resolvable:$true] %s553_s22  ;;  %s556_s25 = int_to_ptr.hbm [resolvable:$true] %s555_s25 }
   0xb   :  { %627 = vmatpush.msra.mxu3 %v67_v4  ;;  %626 = vmatpush.msra.mxu2 %v67_v4  ;;  %v45_v9 = vld [vmem:[%s1021_s1 + $0xd8] sm:$0xff]  ;;  %v58_v12 = vld [vmem:[%s1021_s1 + $0x140] sm:$0xff]  ;;  %v20_v14 = vld [vmem:[%s1021_s1 + $0x10] sm:$0xff] }
   0xc   :  { %236 = vmatpush.msra.mxu0 %v66_v5  ;;  %628 = vmatpush.msra.mxu1 %v66_v5  ;;  %v33_v11 = vld [vmem:[%s1021_s1 + $0x78] sm:$0xff]  ;;  %v46_v13 = vld [vmem:[%s1021_s1 + $0xe0] sm:$0xff]  ;;  %v59_v16 = vld [vmem:[%s1021_s1 + $0x148] sm:$0xff] }
   0xd   :  { %630 = vmatpush.msra.mxu3 %v66_v5  ;;  %565 = vmatmul.msk.f32.vlgmr.msra.gmra.mxu0 %vm72_vm1, %v18_v6  ;;  %v34_v15 = vld [vmem:[%s1021_s1 + $0x80] sm:$0xff]  ;;  %v47_v17 = vld [vmem:[%s1021_s1 + $0xe8] sm:$0xff]  ;;  %v21_v18 = vld [vmem:[%s1021_s1 + $0x18] sm:$0xff] }
   0xe   :  { %579 = vmatmul.msk.f32.vlgmr.msra.gmra.mxu1 %vm72_vm1, %v32_v7  ;;  %604 = vmatmul.msk.f32.vlgmr.msra.gmra.mxu3 %vm72_vm1, %v57_v8  ;;  %v35_v19 = vld [vmem:[%s1021_s1 + $0x88] sm:$0xff]  ;;  %v60_v20 = vld [vmem:[%s1021_s1 + $0x150] sm:$0xff]  ;;  %v22_v22 = vld [vmem:[%s1021_s1 + $0x20] sm:$0xff] }
   0xf   :  { %629 = vmatpush.msra.mxu2 %v66_v5  ;;  %v48_v21 = vld [vmem:[%s1021_s1 + $0xf0] sm:$0xff]  ;;  %v61_v24 = vld [vmem:[%s1021_s1 + $0x158] sm:$0xff]  ;;  %v23_v26 = vld [vmem:[%s1021_s1 + $0x28] sm:$0xff] }
  0x10   :  { %592 = vmatmul.msk.f32.vlgmr.msra.gmra.mxu2 %vm72_vm1, %v45_v9  ;;  %v36_v23 = vld [vmem:[%s1021_s1 + $0x90] sm:$0xff]  ;;  %v49_v25 = vld [vmem:[%s1021_s1 + $0xf8] sm:$0xff]  ;;  %v62_v28 = vld [vmem:[%s1021_s1 + $0x160] sm:$0xff] }
  0x11   :  { %v37_v27 = vld [vmem:[%s1021_s1 + $0x98] sm:$0xff]  ;;  %v50_v29 = vld [vmem:[%s1021_s1 + $0x100] sm:$0xff]  ;;  %v24_v30 = vld [vmem:[%s1021_s1 + $0x30] sm:$0xff] }
  0x12   :  { %v38_v31 = vld [vmem:[%s1021_s1 + $0xa0] sm:$0xff]  ;;  %v63_v32 = vld [vmem:[%s1021_s1 + $0x168] sm:$0xff]  ;;  %v25_v34 = vld [vmem:[%s1021_s1 + $0x38] sm:$0xff] }
  0x13   :  { %v51_v33 = vld [vmem:[%s1021_s1 + $0x108] sm:$0xff]  ;;  %v64_v36 = vld [vmem:[%s1021_s1 + $0x170] sm:$0xff]  ;;  %v26_v38 = vld [vmem:[%s1021_s1 + $0x40] sm:$0xff] }
  0x14   :  { %v39_v35 = vld [vmem:[%s1021_s1 + $0xa8] sm:$0xff]  ;;  %v52_v37 = vld [vmem:[%s1021_s1 + $0x110] sm:$0xff]  ;;  %v65_v40 = vld [vmem:[%s1021_s1 + $0x178] sm:$0xff] }
  0x15   :  { %566 = vmatmul.msk.f32.gmra.mxu0 %vm72_vm1, %v19_v10  ;;  %v40_v39 = vld [vmem:[%s1021_s1 + $0xb0] sm:$0xff]  ;;  %v53_v41 = vld [vmem:[%s1021_s1 + $0x118] sm:$0xff]  ;;  %v27_v42 = vld [vmem:[%s1021_s1 + $0x48] sm:$0xff] }
  0x16   :  { %580 = vmatmul.msk.f32.gmra.mxu1 %vm72_vm1, %v33_v11  ;;  %605 = vmatmul.msk.f32.gmra.mxu3 %vm72_vm1, %v58_v12  ;;  %v41_v43 = vld [vmem:[%s1021_s1 + $0xb8] sm:$0xff]  ;;  %v54_v44 = vld [vmem:[%s1021_s1 + $0x120] sm:$0xff]  ;;  %v28_v45 = vld [vmem:[%s1021_s1 + $0x50] sm:$0xff] }
  0x17   :  { %v42_v46 = vld [vmem:[%s1021_s1 + $0xc0] sm:$0xff]  ;;  %v55_v47 = vld [vmem:[%s1021_s1 + $0x128] sm:$0xff]  ;;  %v29_v48 = vld [vmem:[%s1021_s1 + $0x58] sm:$0xff] }
  0x18   :  { %593 = vmatmul.msk.f32.gmra.mxu2 %vm72_vm1, %v46_v13  ;;  %v43_v49 = vld [vmem:[%s1021_s1 + $0xc8] sm:$0xff]  ;;  %v56_v50 = vld [vmem:[%s1021_s1 + $0x130] sm:$0xff]  ;;  %v30_v51 = vld [vmem:[%s1021_s1 + $0x60] sm:$0xff] }
  0x19   :  { %v44_v52 = vld [vmem:[%s1021_s1 + $0xd0] sm:$0xff]  ;;  %v31_v53 = vld [vmem:[%s1021_s1 + $0x68] sm:$0xff] }
  0x1d   :  { %567 = vmatmul.msk.f32.gmra.mxu0 %vm72_vm1, %v20_v14 }
  0x1e   :  { %581 = vmatmul.msk.f32.gmra.mxu1 %vm72_vm1, %v34_v15  ;;  %606 = vmatmul.msk.f32.gmra.mxu3 %vm72_vm1, %v59_v16 }
  0x20   :  { %594 = vmatmul.msk.f32.gmra.mxu2 %vm72_vm1, %v47_v17 }
  0x25   :  { %568 = vmatmul.msk.f32.gmra.mxu0 %vm72_vm1, %v21_v18 }
  0x26   :  { %582 = vmatmul.msk.f32.gmra.mxu1 %vm72_vm1, %v35_v19  ;;  %607 = vmatmul.msk.f32.gmra.mxu3 %vm72_vm1, %v60_v20 }
  0x28   :  { %595 = vmatmul.msk.f32.gmra.mxu2 %vm72_vm1, %v48_v21 }
  0x2d   :  { %569 = vmatmul.msk.f32.gmra.mxu0 %vm72_vm1, %v22_v22 }
  0x2e   :  { %583 = vmatmul.msk.f32.gmra.mxu1 %vm72_vm1, %v36_v23  ;;  %608 = vmatmul.msk.f32.gmra.mxu3 %vm72_vm1, %v61_v24 }
  0x30   :  { %596 = vmatmul.msk.f32.gmra.mxu2 %vm72_vm1, %v49_v25 }
  0x35   :  { %570 = vmatmul.msk.f32.gmra.mxu0 %vm72_vm1, %v23_v26 }
  0x36   :  { %584 = vmatmul.msk.f32.gmra.mxu1 %vm72_vm1, %v37_v27  ;;  %609 = vmatmul.msk.f32.gmra.mxu3 %vm72_vm1, %v62_v28 }
  0x38   :  { %597 = vmatmul.msk.f32.gmra.mxu2 %vm72_vm1, %v50_v29 }
  0x3d   :  { %571 = vmatmul.msk.f32.gmra.mxu0 %vm72_vm1, %v24_v30 }
  0x3e   :  { %585 = vmatmul.msk.f32.gmra.mxu1 %vm72_vm1, %v38_v31  ;;  %610 = vmatmul.msk.f32.gmra.mxu3 %vm72_vm1, %v63_v32 }
  0x40   :  { %598 = vmatmul.msk.f32.gmra.mxu2 %vm72_vm1, %v51_v33 }
  0x45   :  { %572 = vmatmul.msk.f32.gmra.mxu0 %vm72_vm1, %v25_v34 }
  0x46   :  { %586 = vmatmul.msk.f32.gmra.mxu1 %vm72_vm1, %v39_v35  ;;  %611 = vmatmul.msk.f32.gmra.mxu3 %vm72_vm1, %v64_v36 }
  0x48   :  { %599 = vmatmul.msk.f32.gmra.mxu2 %vm72_vm1, %v52_v37 }
  0x4d   :  { %573 = vmatmul.msk.f32.gmra.mxu0 %vm72_vm1, %v26_v38 }
  0x4e   :  { %587 = vmatmul.msk.f32.gmra.mxu1 %vm72_vm1, %v40_v39  ;;  %612 = vmatmul.msk.f32.gmra.mxu3 %vm72_vm1, %v65_v40 }
  0x50   :  { %600 = vmatmul.msk.f32.gmra.mxu2 %vm72_vm1, %v53_v41 }
  0x55   :  { %574 = vmatmul.msk.f32.gmra.mxu0 %vm72_vm1, %v27_v42 }
  0x56   :  { %588 = vmatmul.msk.f32.gmra.mxu1 %vm72_vm1, %v41_v43 }
  0x58   :  { %601 = vmatmul.msk.f32.gmra.mxu2 %vm72_vm1, %v54_v44 }
  0x5d   :  { %575 = vmatmul.msk.f32.gmra.mxu0 %vm72_vm1, %v28_v45 }
  0x5e   :  { %589 = vmatmul.msk.f32.gmra.mxu1 %vm72_vm1, %v42_v46 }
  0x60   :  { %602 = vmatmul.msk.f32.gmra.mxu2 %vm72_vm1, %v55_v47 }
  0x65   :  { %576 = vmatmul.msk.f32.gmra.mxu0 %vm72_vm1, %v29_v48 }
  0x66   :  { %590 = vmatmul.msk.f32.gmra.mxu1 %vm72_vm1, %v43_v49 }
  0x68   :  { %603 = vmatmul.msk.f32.gmra.mxu2 %vm72_vm1, %v56_v50 }
  0x6d   :  { %577 = vmatmul.msk.f32.gmra.mxu0 %vm72_vm1, %v30_v51 }
  0x6e   :  { %591 = vmatmul.msk.f32.gmra.mxu1 %vm72_vm1, %v44_v52 }
  0x75   :  { %578 = vmatmul.msk.f32.gmra.mxu0 %vm72_vm1, %v31_v53 }
  0x8a   :  { %v897_v54 = vpop.f32.mrf.mxu0 }
  0x8b   :  { %v280_v55 = vpop.f32.mrf.mxu1 }
  0x8c   :  { %v396_v60 = vmul.f32 0.1, %v280_v55 }
  0x8e   :  { %v444_v63 = vmax.f32 %v280_v55, %v396_v60 }
  0x91   :  { %v899_v56 = vpop.f32.mrf.mxu3 }
  0x92   :  { %v901_v57 = vpop.f32.mrf.mxu0 }
  0x93   :  { %v283_v58 = vpop.f32.mrf.mxu1  ;;  %v319_v59 = vpop.f32.mrf.mxu2 }
  0x94   :  { %v397_v61 = vmul.f32 0.1, %v283_v58  ;;  %v409_v24 = vmul.f32 0.1, %v319_v59 }
  0x96   :  { %v445_v62 = vmax.f32 %v283_v58, %v397_v61  ;;  %v457_v29 = vmax.f32 %v319_v59, %v409_v24 }
  0x98   :  { %487 = vmatpush.msrb.mxu1 %v445_v62  ;;  %v421_v62 = vmul.f32 0.1, %v899_v56 }
  0x99   :  { %v903_v0 = vpop.f32.mrf.mxu3 }
  0x9a   :  { %v905_v1 = vpop.f32.mrf.mxu0  ;;  %488 = vmatpush.msrb.mxu1 %v444_v63  ;;  %v422_v60 = vmul.f32 0.1, %v903_v0 }
  0x9b   :  { %v907_v2 = vpop.f32.mrf.mxu1  ;;  %v322_v3 = vpop.f32.mrf.mxu2 }
  0x9c   :  { %v410_v21 = vmul.f32 0.1, %v322_v3 }
  0x9e   :  { %v458_v28 = vmax.f32 %v322_v3, %v410_v21 }
  0xa1   :  { %v909_v4 = vpop.f32.mrf.mxu3 }
  0xa2   :  { %v911_v5 = vpop.f32.mrf.mxu0  ;;  %v423_v58 = vmul.f32 0.1, %v909_v4 }
  0xa3   :  { %v913_v6 = vpop.f32.mrf.mxu1  ;;  %v325_v7 = vpop.f32.mrf.mxu2 }
  0xa4   :  { %v411_v17 = vmul.f32 0.1, %v325_v7  ;;  %v471_v63 = vmax.f32 %v909_v4, %v423_v58 }
  0xa6   :  { %v459_v22 = vmax.f32 %v325_v7, %v411_v17  ;;  %v470_v7 = vmax.f32 %v903_v0, %v422_v60 }
  0xa9   :  { %v364_v8 = vpop.f32.mrf.mxu3 }
  0xaa   :  { %v915_v9 = vpop.f32.mrf.mxu0  ;;  %v424_v50 = vmul.f32 0.1, %v364_v8 }
  0xab   :  { %v917_v10 = vpop.f32.mrf.mxu1  ;;  %v328_v11 = vpop.f32.mrf.mxu2 }
  0xac   :  { %v412_v13 = vmul.f32 0.1, %v328_v11  ;;  %v472_v61 = vmax.f32 %v364_v8, %v424_v50 }
  0xae   :  { %v460_v20 = vmax.f32 %v328_v11, %v412_v13 }
  0xb1   :  { %v367_v12 = vpop.f32.mrf.mxu3 }
  0xb2   :  { %v919_v14 = vpop.f32.mrf.mxu0  ;;  %v425_v49 = vmul.f32 0.1, %v367_v12 }
  0xb3   :  { %v921_v15 = vpop.f32.mrf.mxu1  ;;  %v331_v16 = vpop.f32.mrf.mxu2 }
  0xb4   :  { %v413_v18 = vmul.f32 0.1, %v331_v16  ;;  %v473_v59 = vmax.f32 %v367_v12, %v425_v49 }
  0xb6   :  { %v461_v19 = vmax.f32 %v331_v16, %v413_v18  ;;  %v469_v16 = vmax.f32 %v899_v56, %v421_v62 }
  0xb8   :  { %507 = vmatpush.msrb.mxu2 %v461_v19 }
  0xb9   :  { %v370_v23 = vpop.f32.mrf.mxu3 }
  0xba   :  { %v923_v25 = vpop.f32.mrf.mxu0  ;;  %508 = vmatpush.msrb.mxu2 %v460_v20  ;;  %v426_v47 = vmul.f32 0.1, %v370_v23 }
  0xbb   :  { %v925_v26 = vpop.f32.mrf.mxu1  ;;  %v927_v27 = vpop.f32.mrf.mxu2 }
  0xbc   :  { %509 = vmatpush.msrb.mxu2 %v459_v22  ;;  %v474_v52 = vmax.f32 %v370_v23, %v426_v47  ;;  %v660_v47 = vmov 0   ;;  %v402_v58 = vmul.f32 0.1, %v925_v26 }
  0xbd   :  { %633 = vset.pattern.permute.xlu0 %v660_v47 }
  0xbe   :  { %510 = vmatpush.msrb.mxu2 %v458_v28 }
  0xc0   :  { %511 = vmatpush.msrb.mxu2 %v457_v29 }
  0xc1   :  { %v373_v30 = vpop.f32.mrf.mxu3 }
  0xc2   :  { %v929_v31 = vpop.f32.mrf.mxu0  ;;  %v427_v40 = vmul.f32 0.1, %v373_v30 }
  0xc3   :  { %v931_v32 = vpop.f32.mrf.mxu1  ;;  %v933_v33 = vpop.f32.mrf.mxu2 }
  0xc4   :  { %v475_v48 = vmax.f32 %v373_v30, %v427_v40  ;;  %v415_v49 = vmul.f32 0.1, %v933_v33 }
  0xc9   :  { %v376_v34 = vpop.f32.mrf.mxu3 }
  0xca   :  { %v935_v35 = vpop.f32.mrf.mxu0  ;;  %v428_v38 = vmul.f32 0.1, %v376_v34 }
  0xcb   :  { %v937_v36 = vpop.f32.mrf.mxu1  ;;  %v939_v37 = vpop.f32.mrf.mxu2 }
  0xcc   :  { %v476_v46 = vmax.f32 %v376_v34, %v428_v38  ;;  %v404_v34 = vmul.f32 0.1, %v937_v36  ;;  %v416_v38 = vmul.f32 0.1, %v939_v37 }
  0xce   :  { %v452_v60 = vmax.f32 %v937_v36, %v404_v34 }
  0xd1   :  { %v379_v39 = vpop.f32.mrf.mxu3 }
  0xd2   :  { %v429_v41 = vmul.f32 0.1, %v379_v39  ;;  %v941_v42 = vpop.f32.mrf.mxu0 }
  0xd3   :  { %v943_v43 = vpop.f32.mrf.mxu1  ;;  %v945_v44 = vpop.f32.mrf.mxu2 }
  0xd4   :  { %v477_v45 = vmax.f32 %v379_v39, %v429_v41  ;;  %v405_v0 = vmul.f32 0.1, %v943_v43  ;;  %v417_v29 = vmul.f32 0.1, %v945_v44  ;;  %v481_v41 = vld [vmem:[%s1023_s3] sm:$0x7f] }
  0xd5   :  { %484 = vperm.xlu0 %633, %v481_v41  }
  0xd6   :  { %527 = vmatpush.msrb.mxu3 %v477_v45  ;;  %v453_v50 = vmax.f32 %v943_v43, %v405_v0 }
  0xd8   :  { %528 = vmatpush.msrb.mxu3 %v476_v46 }
  0xda   :  { %529 = vmatpush.msrb.mxu3 %v475_v48  ;;  %v947_v51 = vpop.f32.mrf.mxu0  ;;  %v403_v48 = vmul.f32 0.1, %v931_v32 }
  0xdb   :  { %v310_v53 = vpop.f32.mrf.mxu1  ;;  %v346_v55 = vpop.f32.mrf.mxu2  ;;  %v392_v62 = vmul.f32 0.1, %v947_v51 }
  0xdc   :  { %530 = vmatpush.msrb.mxu3 %v474_v52  ;;  %v418_v18 = vmul.f32 0.1, %v346_v55  ;;  %v406_v4 = vmul.f32 0.1, %v310_v53  ;;  %v465_v52 = vmax.f32 %v945_v44, %v417_v29  ;;  %v401_v44 = vmul.f32 0.1, %v921_v15 }
  0xde   :  { %531 = vmatpush.msrb.mxu3 %v473_v59  ;;  %v466_v56 = vmax.f32 %v346_v55, %v418_v18  ;;  %v454_v40 = vmax.f32 %v310_v53, %v406_v4  ;;  %v414_v59 = vmul.f32 0.1, %v927_v27  ;;  %v398_v18 = vmul.f32 0.1, %v907_v2 }
  0xe0   :  { %532 = vmatpush.msrb.mxu3 %v472_v61  ;;  %v464_v61 = vmax.f32 %v939_v37, %v416_v38  ;;  %v450_v37 = vmax.f32 %v925_v26, %v402_v58  ;;  %v389_v26 = vmul.f32 0.1, %v929_v31 }
  0xe2   :  { %533 = vmatpush.msrb.mxu3 %v471_v63  ;;  %v953_v3 = vpop.f32.mrf.mxu0  ;;  %v451_v63 = vmax.f32 %v931_v32, %v403_v48  ;;  %v480_v32 = vld [vmem:[%s1022_s2 + $0x10] sm:$0x7f] }
  0xe3   :  { %v313_v11 = vpop.f32.mrf.mxu1  ;;  %v349_v13 = vpop.f32.mrf.mxu2  ;;  %v393_v53 = vmul.f32 0.1, %v953_v3 }
  0xe4   :  { %534 = vmatpush.msrb.mxu3 %v470_v7  ;;  %v419_v12 = vmul.f32 0.1, %v349_v13  ;;  %v407_v20 = vmul.f32 0.1, %v313_v11  ;;  %v463_v7 = vmax.f32 %v933_v33, %v415_v49  ;;  %v440_v33 = vmax.f32 %v947_v51, %v392_v62 }
  0xe5   :  { %v441_v36 = vmax.f32 %v953_v3, %v393_v53  ;;  %v449_v3 = vmax.f32 %v921_v15, %v401_v44 }
  0xe6   :  { %535 = vmatpush.msrb.mxu3 %v469_v16  ;;  %v467_v28 = vmax.f32 %v349_v13, %v419_v12  ;;  %v455_v30 = vmax.f32 %v313_v11, %v407_v20  ;;  %v391_v11 = vmul.f32 0.1, %v941_v42  ;;  %v400_v13 = vmul.f32 0.1, %v917_v10 }
  0xe7   :  { %v462_v16 = vmax.f32 %v927_v27, %v414_v59  ;;  %v390_v12 = vmul.f32 0.1, %v935_v35  ;;  %v387_v20 = vmul.f32 0.1, %v919_v14 }
  0xe8   :  { %v439_v27 = vmax.f32 %v941_v42, %v391_v11  ;;  %v446_v42 = vmax.f32 %v907_v2, %v398_v18 }
  0xe9   :  { %v438_v51 = vmax.f32 %v935_v35, %v390_v12  ;;  %v435_v4 = vmax.f32 %v919_v14, %v387_v20 }
  0xea   :  { %v274_v17 = vpop.f32.mrf.mxu0 }
  0xeb   :  { %v316_v8 = vpop.f32.mrf.mxu1  ;;  %v352_v19 = vpop.f32.mrf.mxu2  ;;  %v394_v45 = vmul.f32 0.1, %v274_v17 }
  0xec   :  { %v408_v21 = vmul.f32 0.1, %v316_v8  ;;  %v420_v22 = vmul.f32 0.1, %v352_v19 }
  0xed   :  { %v442_v43 = vmax.f32 %v274_v17, %v394_v45  ;;  %v399_v17 = vmul.f32 0.1, %v913_v6 }
  0xee   :  { %v456_v23 = vmax.f32 %v316_v8, %v408_v21  ;;  %v468_v24 = vmax.f32 %v352_v19, %v420_v22  ;;  %v448_v8 = vmax.f32 %v917_v10, %v400_v13  ;;  %v388_v19 = vmul.f32 0.1, %v923_v25  ;;  %v479_v10 = vld [vmem:[%s1022_s2 + $0x8] sm:$0x7f] }
  0xef   :  { %v447_v15 = vmax.f32 %v913_v6, %v399_v17  ;;  %v437_v21 = vmax.f32 %v929_v31, %v389_v26  ;;  %v386_v22 = vmul.f32 0.1, %v915_v9  ;;  %v385_v6 = vmul.f32 0.1, %v911_v5 }
  0xf0   :  { %512 = vmatpush.msrb.mxu2 %v456_v23  ;;  %536 = vmatpush.msrb.mxu3 %v468_v24  ;;  %v436_v35 = vmax.f32 %v923_v25, %v388_v19  ;;  %v384_v31 = vmul.f32 0.1, %v905_v1  ;;  %v383_v23 = vmul.f32 0.1, %v901_v57 }
  0xf1   :  { %v434_v2 = vmax.f32 %v915_v9, %v386_v22  ;;  %v433_v24 = vmax.f32 %v911_v5, %v385_v6  ;;  %v478_v9 = vld [vmem:[%s1022_s2] sm:$0x7f] }
  0xf2   :  { %513 = vmatpush.msrb.mxu2 %v455_v30  ;;  %v277_v39 = vpop.f32.mrf.mxu0  ;;  %537 = vmatpush.msrb.mxu3 %v467_v28  ;;  %v382_v28 = vmul.f32 0.1, %v897_v54  ;;  %v432_v25 = vmax.f32 %v905_v1, %v384_v31  ;;  %v431_v0 = vmax.f32 %v901_v57, %v383_v23 }
  0xf3   :  { %v395_v46 = vmul.f32 0.1, %v277_v39 }
  0xf4   :  { %514 = vmatpush.msrb.mxu2 %v454_v40  ;;  %538 = vmatpush.msrb.mxu3 %v466_v56  ;;  %v430_v14 = vmax.f32 %v897_v54, %v382_v28 }
  0xf5   :  { %v443_v55 = vmax.f32 %v277_v39, %v395_v46 }
  0xf6   :  { %515 = vmatpush.msrb.mxu2 %v453_v50  ;;  %539 = vmatpush.msrb.mxu3 %v465_v52 }
  0xf7   :  { %489 = vmatpush.msrb.mxu1 %v443_v55 }
  0xf8   :  { %516 = vmatpush.msrb.mxu2 %v452_v60  ;;  %540 = vmatpush.msrb.mxu3 %v464_v61 }
  0xf9   :  { %490 = vmatpush.msrb.mxu1 %v442_v43 }
  0xfa   :  { %517 = vmatpush.msrb.mxu2 %v451_v63  ;;  %541 = vmatpush.msrb.mxu3 %v463_v7 }
  0xfb   :  { %491 = vmatpush.msrb.mxu1 %v441_v36 }
  0xfc   :  { %518 = vmatpush.msrb.mxu2 %v450_v37  ;;  %542 = vmatpush.msrb.mxu3 %v462_v16 }
  0xfd   :  { %492 = vmatpush.msrb.mxu1 %v440_v33  ;;  %543 = vmatmul.f32.vlgmr.msrb.gmra.mxu3 %v480_v32 }
  0xfe   :  { %519 = vmatpush.msrb.mxu2 %v449_v3 }
  0xff   :  { %493 = vmatpush.msrb.mxu1 %v439_v27 }
 0x100   :  { %520 = vmatpush.msrb.mxu2 %v448_v8 }
 0x101   :  { %494 = vmatpush.msrb.mxu1 %v438_v51 }
 0x102   :  { %521 = vmatpush.msrb.mxu2 %v447_v15 }
 0x103   :  { %495 = vmatpush.msrb.mxu1 %v437_v21 }
 0x104   :  { %522 = vmatpush.msrb.mxu2 %v446_v42 }
 0x105   :  { %496 = vmatpush.msrb.mxu1 %v436_v35  ;;  %523 = vmatmul.f32.vlgmr.msrb.gmra.mxu2 %v479_v10 }
 0x107   :  { %497 = vmatpush.msrb.mxu1 %v435_v4 }
 0x109   :  { %498 = vmatpush.msrb.mxu1 %v434_v2 }
 0x10b   :  { %499 = vmatpush.msrb.mxu1 %v433_v24 }
 0x10d   :  { %500 = vmatpush.msrb.mxu1 %v432_v25 }
 0x10f   :  { %501 = vmatpush.msrb.mxu1 %v431_v0 }
 0x111   :  { %502 = vmatpush.msrb.mxu1 %v430_v14 }
 0x112   :  { %503 = vmatmul.f32.vlgmr.msrb.gmra.mxu1 %v478_v9 }
 0x147   :  { %v485_v29 = vpop.permute.xlu0 %484 }
 0x180   :  { %v544_v34 = vpop.f32.mrf.mxu3 }
 0x188   :  { %v524_v5 = vpop.f32.mrf.mxu2 }
 0x18f   :  { %v504_v30 = vpop.f32.mrf.mxu1 }
 0x190   :  { %v505_v56 = vadd.f32 %v504_v30, %v485_v29 }
 0x192   :  { %v525_v57 = vadd.f32 %v524_v5, %v505_v56 }
 0x194   :  { %v545_v1 = vadd.f32 %v544_v34, %v525_v57 }
 0x196   :  { %547 = vst [vmem:[#allocation2] sm:$0x7f] %v545_v1 }
 0x197   :  { %558 = dma.vmem_to_hbm [thread:$0]  %s554_s22, 128, %s556_s25, [#allocation3]  }
 0x198   :  { %658 = dma.done.wait [#allocation3], 128  }
 0x199   :  { %659 = vsyncadd [#allocation3], 4294967168 }
 0x19a   :  { %563 = vsyncpa [#allocation3], 1 }

</bundles_post_ra>
